<compile_context>
chip_gen: v7x
topology: tpu7x:2x2x1
jax: 0.10.0
libtpu: 0.0.40
codegen_flags: <defaults>
</compile_context>

<pallas_src>
import math

import jax
import jax.numpy as jnp
from jax.experimental import pallas as pl
from jax.experimental.pallas import tpu as pltpu


def _round_up(x, m):
    return ((x + m - 1) // m) * m


def _cdiv(a, b):
    return -(-a // b)


def _vmem_capacity_bytes():
    """Physical per-core VMEM (64 MiB on v7x, 128 MiB on v5e/v6e)."""
    try:
        return int(pltpu.get_tpu_info().vmem_capacity_bytes)
    except Exception:
        return 64 * 1024 * 1024


# ----------------------------------------------------------------------------
# Kernel
# ----------------------------------------------------------------------------
def _decoder_env_lstm_kernel(s_ref, a_ref, w_ih3_ref, b3_ref, w_lin_ref,
                             wab_ref, out_ref):
    """One batch tile of the fused LSTM-cell + Linear + ReLU.

    s_ref     : (TB, Hp)    f32/bf16  input state tile (cast to bf16 in-kernel)
    a_ref     : (TB, 1)     f32       action scalar per row
    w_ih3_ref : (Hp, 3*Hp)  bf16      [W_i | W_g | W_o]^T  (forget gate dropped)
    b3_ref    : (1, 3*Hp)   f32       b_ih + b_hh for the i/g/o gates
    w_lin_ref : (Hp, Hp)    bf16      W_lin[:, :H]^T  (h part of the linear)
    wab_ref   : (2, Hp)     f32       row 0 = W_lin[:, H] (a column), row 1 = b_lin
    out_ref   : (TB, Hp)    f32
    """
    Hp = w_lin_ref.shape[0]

    # LSTM cell, single step, zero initial state (h0 = c0 = 0); the forget
    # gate multiplies c0 == 0 so it is removed from weights and compute.
    s = s_ref[...].astype(jnp.bfloat16)
    gates = jnp.dot(s, w_ih3_ref[...],
                    preferred_element_type=jnp.float32) + b3_ref[...]

    # sigmoid(x) == 0.5*tanh(0.5*x) + 0.5  -> 1 EUP push per element instead
    # of exp + reciprocal. Padded lanes stay exact: sigmoid(0)=0.5, tanh(0)=0
    # => h1 padded lanes are exactly 0.
    i_g = 0.5 * jnp.tanh(0.5 * gates[:, 0 * Hp:1 * Hp]) + 0.5
    g_g = jnp.tanh(gates[:, 1 * Hp:2 * Hp])
    o_g = 0.5 * jnp.tanh(0.5 * gates[:, 2 * Hp:3 * Hp]) + 0.5
    h1 = o_g * jnp.tanh(i_g * g_g)                       # f32, (TB, Hp)

    # Linear(ninp+1 -> ninp) on concat([h1, a]); the concat is folded into a
    # split weight:  out = h1 @ W_h^T + a * w_a + b_lin, then ReLU.
    a = a_ref[...]                                       # (TB, 1) f32
    lin = (jnp.dot(h1.astype(w_lin_ref.dtype), w_lin_ref[...],
                   preferred_element_type=jnp.float32)
           + a * wab_ref[0:1, :]
           + wab_ref[1:2, :])
    out_ref[...] = jnp.maximum(lin, 0.0)


# ----------------------------------------------------------------------------
# Parameters
# ----------------------------------------------------------------------------
def init_params(key, ninp):
    """PyTorch-layout parameters (same shapes as the nn.Module's tensors)."""
    k = jax.random.split(key, 6)
    bound_lstm = 1.0 / math.sqrt(ninp)
    bound_lin = 1.0 / math.sqrt(ninp + 1)
    return dict(
        w_ih=jax.random.uniform(k[0], (4 * ninp, ninp), jnp.float32,
                                -bound_lstm, bound_lstm),
        w_hh=jax.random.uniform(k[1], (4 * ninp, ninp), jnp.float32,
                                -bound_lstm, bound_lstm),   # unused (h0 = 0)
        b_ih=jax.random.uniform(k[2], (4 * ninp,), jnp.float32,
                                -bound_lstm, bound_lstm),
        b_hh=jax.random.uniform(k[3], (4 * ninp,), jnp.float32,
                                -bound_lstm, bound_lstm),
        w_lin=jax.random.uniform(k[4], (ninp, ninp + 1), jnp.float32,
                                 -bound_lin, bound_lin),
        b_lin=jax.random.uniform(k[5], (ninp,), jnp.float32,
                                 -bound_lin, bound_lin),
    )


def prepare_params(params, ninp):
    """One-time weight re-layout (call once at init, NOT per forward step).

    * drops the forget gate, fuses b_ih + b_hh
    * transposes to (in, out) for row-major MXU matmuls
    * zero-pads the hidden dim to a 128-lane multiple (aligned gate slices,
      lane-dense output stores); padded gate columns yield h1 == 0 exactly
    * casts matmul operands to bf16 (accumulation stays f32 in the kernel)
    """
    H = ninp
    Hp = _round_up(max(H, 128), 128)

    # i / g / o gate rows of PyTorch's weight_ih_l0 (forget gate dropped).
    gate_rows = (slice(0 * H, 1 * H), slice(2 * H, 3 * H), slice(3 * H, 4 * H))
    b_fused = params["b_ih"] + params["b_hh"]

    w_ih3 = jnp.zeros((Hp, 3 * Hp), jnp.float32)
    b3 = jnp.zeros((1, 3 * Hp), jnp.float32)
    for k, rows in enumerate(gate_rows):
        w_ih3 = w_ih3.at[:H, k * Hp:k * Hp + H].set(params["w_ih"][rows].T)
        b3 = b3.at[0, k * Hp:k * Hp + H].set(b_fused[rows])

    w_lin_h = jnp.zeros((Hp, Hp), jnp.float32)
    w_lin_h = w_lin_h.at[:H, :H].set(params["w_lin"][:, :H].T)

    wab = jnp.zeros((2, Hp), jnp.float32)
    wab = wab.at[0, :H].set(params["w_lin"][:, H])       # a column of W_lin
    wab = wab.at[1, :H].set(params["b_lin"])             # linear bias

    return dict(
        Hp=Hp,
        w_ih3_t=w_ih3.astype(jnp.bfloat16),
        b3=b3,
        w_lin_h_t=w_lin_h.astype(jnp.bfloat16),
        wab=wab,
    )


# ----------------------------------------------------------------------------
# Forward
# ----------------------------------------------------------------------------
def decoder_env_lstm_forward(s, a, t, prepared, n_channel, *, batch_tile=None):
    """s: (B, 1, ninp), a: (B, 1, 1) -> ((B, 1, ninp) f32, rewards)."""
    B, one, ninp = s.shape
    assert one == 1
    Hp = prepared["Hp"]

    vmem_cap = _vmem_capacity_bytes()
    if batch_tile is None:
        # Larger tiles on 128 MiB parts amortize per-grid-step overhead.
        batch_tile = 512 if vmem_cap > (64 << 20) else 256

    # Batch tiling: near-even tiles (minimal padding waste on the last tile),
    # and >= 2 tiles whenever B allows so ("parallel",) shards the grid over
    # both v7x TensorCores. Never split below 16 real rows per tile.
    n_tiles = max(_cdiv(B, batch_tile), 2)
    n_tiles = min(n_tiles, max(_cdiv(B, 16), 1))
    tb = _round_up(_cdiv(B, n_tiles), 16)
    B_pad = n_tiles * tb

    # Activation staging. Fast path (ninp % 128 == 0): no lane padding, feed s
    # with only a reshape and cast to bf16 inside the kernel -> no extra HBM
    # read+write of the activations before the (mem-bound) kernel.
    if ninp == Hp:
        if B_pad == B:
            s_in = s.reshape(B, Hp)                     # zero-copy view
            a_in = a.reshape(B, 1).astype(jnp.float32)
        else:
            s_in = jnp.zeros((B_pad, Hp), s.dtype).at[:B].set(s.reshape(B, Hp))
            a_in = jnp.zeros((B_pad, 1), jnp.float32).at[:B].set(
                a.reshape(B, 1).astype(jnp.float32))
    else:
        s_in = jnp.zeros((B_pad, Hp), jnp.bfloat16).at[:B, :ninp].set(
            s.reshape(B, ninp).astype(jnp.bfloat16))
        a_in = jnp.zeros((B_pad, 1), jnp.float32).at[:B].set(
            a.reshape(B, 1).astype(jnp.float32))
    s_bytes = jnp.dtype(s_in.dtype).itemsize

    # Constant-index weights/biases: single-buffered residency (the block
    # index never changes, so double-buffering only doubles VMEM footprint).
    def _const_spec(shape):
        return pl.BlockSpec(shape, lambda i: (0, 0),
                            pipeline_mode=pl.Buffered(1))

    # Explicit VMEM budget: double-buffered activations + single-buffered
    # resident weights, generation-aware ceiling with headroom.
    vmem_need = int(
        2 * (tb * Hp * s_bytes + tb * 128 * 4 + tb * Hp * 4)   # s / a / out
        + (Hp * 3 * Hp * 2 + Hp * Hp * 2)                      # weights (bf16)
        + (8 * 3 * Hp * 4 + 8 * Hp * 4)                        # small biases
        + (2 << 20))                                           # slack
    if vmem_cap <= (64 << 20):
        vmem_ceiling = 56 << 20       # v7x-class: leave ~8 MiB headroom
    else:
        vmem_ceiling = 100 << 20      # v5e/v6e: 128 MiB physical VMEM
    vmem_limit = min(max(vmem_need, 32 << 20), vmem_ceiling)
    # TODO(synk): when single-buffered weights (~8*Hp^2 bytes) exceed ~70% of
    # vmem_ceiling (Hp ~2.2k on v7x), add a trailing "arbitrary" grid axis
    # that streams w_ih3 in (Hp, Hp) gate chunks into a VMEM gates scratch and
    # runs the nonlinearities + second matmul under pl.when on the last step.

    flops = 2 * B_pad * Hp * (3 * Hp) + 2 * B_pad * Hp * Hp
    transcendentals = 4 * B_pad * Hp
    bytes_accessed = (B_pad * Hp * (s_bytes + 4) + B_pad * 4
                      + (3 * Hp * Hp + Hp * Hp) * 2
                      + (3 * Hp + 2 * Hp) * 4)

    out = pl.pallas_call(
        _decoder_env_lstm_kernel,
        # Output kept f32 to match the PyTorch interface; switch to bf16 here
        # if the consumer tolerates it (halves the largest HBM stream).
        out_shape=jax.ShapeDtypeStruct((B_pad, Hp), jnp.float32),
        grid=(n_tiles,),
        in_specs=[
            pl.BlockSpec((tb, Hp), lambda i: (i, 0)),      # s tile
            pl.BlockSpec((tb, 1), lambda i: (i, 0)),       # a tile
            _const_spec((Hp, 3 * Hp)),                     # W_ih (i|g|o)^T
            _const_spec((1, 3 * Hp)),                      # fused LSTM bias
            _const_spec((Hp, Hp)),                         # W_lin (h part)^T
            _const_spec((2, Hp)),                          # [w_a ; b_lin]
        ],
        out_specs=pl.BlockSpec((tb, Hp), lambda i: (i, 0)),
        compiler_params=pltpu.CompilerParams(
            dimension_semantics=("parallel",),
            vmem_limit_bytes=vmem_limit),
        cost_estimate=pl.CostEstimate(flops=flops,
                                      transcendentals=transcendentals,
                                      bytes_accessed=bytes_accessed),
    )(s_in, a_in, prepared["w_ih3_t"], prepared["b3"],
      prepared["w_lin_h_t"], prepared["wab"])

    # TODO(synk): the t == n_channel - 1 branch of the reference returns an
    # undefined `rewards` (NameError in PyTorch); only the non-done path is
    # implemented, where rewards = 0.
    rewards = 0
    return out[:B, :ninp].reshape(B, 1, ninp), rewards


# ----------------------------------------------------------------------------
# Reference (pure JAX, mirrors the kernel's bf16 matmul-operand rounding)
# ----------------------------------------------------------------------------
def _reference_forward(s, a, params):
    B, _, H = s.shape
    rb = lambda x: x.astype(jnp.bfloat16).astype(jnp.float32)
    x = rb(s.reshape(B, H))
    gates = x @ rb(params["w_ih"]).T + params["b_ih"] + params["b_hh"]
    i = jax.nn.sigmoid(gates[:, 0 * H:1 * H])
    g = jnp.tanh(gates[:, 2 * H:3 * H])
    o = jax.nn.sigmoid(gates[:, 3 * H:4 * H])
    h = o * jnp.tanh(i * g)
    lin = (rb(h) @ rb(params["w_lin"][:, :H]).T
           + a.reshape(B, 1) * params["w_lin"][:, H][None, :]
           + params["b_lin"][None, :])
    return jnp.maximum(lin, 0.0).reshape(B, 1, H)


if __name__ == "__main__":
    key = jax.random.PRNGKey(0)

    # (ninp, n_channel, batch): first case exercises the lane-padded path
    # (ninp=32 -> Hp=128, B padded), second the zero-copy fast path with a
    # 2-tile batch grid (ninp=128, B=64 -> two 32-row tiles, no padding).
    cases = [(32, 4, 2), (128, 4, 64)]

    for ninp, n_channel, batch in cases:
        key, k_s, k_a, k_p = jax.random.split(key, 4)
        s = jax.random.normal(k_s, (batch, 1, ninp), jnp.float32)
        a = jax.random.normal(k_a, (batch, 1, 1), jnp.float32)
        t = 0  # not the done step

        params = init_params(k_p, ninp)
        prepared = prepare_params(params, ninp)   # one-time re-layout

        out, rewards = decoder_env_lstm_forward(s, a, t, prepared, n_channel)
        out = jax.block_until_ready(out)

        ref = _reference_forward(s, a, params)
        assert out.shape == (batch, 1, ninp)
        assert rewards == 0
        assert jnp.allclose(out, ref, atol=5e-3, rtol=5e-3), (
            f"mismatch vs reference (ninp={ninp}, B={batch}): max abs diff "
            f"{float(jnp.max(jnp.abs(out - ref)))}")

    print("KERNEL_OK")
</pallas_src>

<mosaic_0001>
module attributes {stable_mosaic.version = 11 : i64} {
  func.func @_decoder_env_lstm_kernel(%arg0: i32, %arg1: memref<16x128xbf16, #tpu.memory_space<vmem>>, %arg2: memref<16x1xf32, #tpu.memory_space<vmem>>, %arg3: memref<128x384xbf16, #tpu.memory_space<vmem>>, %arg4: memref<1x384xf32, #tpu.memory_space<vmem>>, %arg5: memref<128x128xbf16, #tpu.memory_space<vmem>>, %arg6: memref<2x128xf32, #tpu.memory_space<vmem>>, %arg7: memref<16x128xf32, #tpu.memory_space<vmem>>) attributes {dimension_semantics = [#tpu.dimension_semantics<parallel>], iteration_bounds = array<i64: 1>, scalar_prefetch = 0 : i64, scratch_operands = 0 : i64, tpu.core_type = #tpu.core_type<tc>, window_params = [{transform_indices = @transform_0, window_bounds = array<i64: 16, 128>}, {transform_indices = @transform_1, window_bounds = array<i64: 16, 1>}, {pipeline_mode = #tpu.pipeline_mode<synchronous>, transform_indices = @transform_2, window_bounds = array<i64: 128, 384>}, {pipeline_mode = #tpu.pipeline_mode<synchronous>, transform_indices = @transform_3, window_bounds = array<i64: 1, 384>}, {pipeline_mode = #tpu.pipeline_mode<synchronous>, transform_indices = @transform_4, window_bounds = array<i64: 128, 128>}, {pipeline_mode = #tpu.pipeline_mode<synchronous>, transform_indices = @transform_5, window_bounds = array<i64: 2, 128>}, {transform_indices = @transform_6, window_bounds = array<i64: 16, 128>}]} {
    %c0 = arith.constant 0 : index
    %c0_0 = arith.constant 0 : index
    %0 = vector.load %arg1[%c0, %c0_0] : memref<16x128xbf16, #tpu.memory_space<vmem>>, vector<16x128xbf16>
    %c0_1 = arith.constant 0 : index
    %c0_2 = arith.constant 0 : index
    %1 = vector.load %arg3[%c0_1, %c0_2] : memref<128x384xbf16, #tpu.memory_space<vmem>>, vector<128x384xbf16>
    %cst = arith.constant dense<0.000000e+00> : vector<16x384xf32>
    %2 = tpu.matmul %0, %1, %cst {dimension_numbers = #tpu.dot_dimension_numbers<[1], [0], [0], [1], [0, 0, 1, 1], [], []>} : vector<16x128xbf16>, vector<128x384xbf16>, vector<16x384xf32> -> vector<16x384xf32>
    %c0_3 = arith.constant 0 : index
    %c0_4 = arith.constant 0 : index
    %3 = vector.load %arg4[%c0_3, %c0_4] : memref<1x384xf32, #tpu.memory_space<vmem>>, vector<1x384xf32>
    %4 = vector.broadcast %3 : vector<1x384xf32> to vector<16x384xf32>
    %5 = arith.addf %2, %4 : vector<16x384xf32>
    %6 = vector.extract_strided_slice %5 {offsets = [0, 0], sizes = [16, 128], strides = [1, 1]} : vector<16x384xf32> to vector<16x128xf32>
    %cst_5 = arith.constant 5.000000e-01 : f32
    %7 = vector.broadcast %cst_5 : f32 to vector<16x128xf32>
    %8 = arith.mulf %7, %6 : vector<16x128xf32>
    %9 = math.tanh %8 : vector<16x128xf32>
    %cst_6 = arith.constant 5.000000e-01 : f32
    %10 = vector.broadcast %cst_6 : f32 to vector<16x128xf32>
    %11 = arith.mulf %10, %9 : vector<16x128xf32>
    %cst_7 = arith.constant 5.000000e-01 : f32
    %12 = vector.broadcast %cst_7 : f32 to vector<16x128xf32>
    %13 = arith.addf %11, %12 : vector<16x128xf32>
    %14 = vector.extract_strided_slice %5 {offsets = [0, 128], sizes = [16, 128], strides = [1, 1]} : vector<16x384xf32> to vector<16x128xf32>
    %15 = math.tanh %14 : vector<16x128xf32>
    %16 = vector.extract_strided_slice %5 {offsets = [0, 256], sizes = [16, 128], strides = [1, 1]} : vector<16x384xf32> to vector<16x128xf32>
    %cst_8 = arith.constant 5.000000e-01 : f32
    %17 = vector.broadcast %cst_8 : f32 to vector<16x128xf32>
    %18 = arith.mulf %17, %16 : vector<16x128xf32>
    %19 = math.tanh %18 : vector<16x128xf32>
    %cst_9 = arith.constant 5.000000e-01 : f32
    %20 = vector.broadcast %cst_9 : f32 to vector<16x128xf32>
    %21 = arith.mulf %20, %19 : vector<16x128xf32>
    %cst_10 = arith.constant 5.000000e-01 : f32
    %22 = vector.broadcast %cst_10 : f32 to vector<16x128xf32>
    %23 = arith.addf %21, %22 : vector<16x128xf32>
    %24 = arith.mulf %13, %15 : vector<16x128xf32>
    %25 = math.tanh %24 : vector<16x128xf32>
    %26 = arith.mulf %23, %25 : vector<16x128xf32>
    %c0_11 = arith.constant 0 : index
    %c0_12 = arith.constant 0 : index
    %27 = vector.load %arg2[%c0_11, %c0_12] : memref<16x1xf32, #tpu.memory_space<vmem>>, vector<16x1xf32>
    %28 = arith.truncf %26 : vector<16x128xf32> to vector<16x128xbf16>
    %c0_13 = arith.constant 0 : index
    %c0_14 = arith.constant 0 : index
    %29 = vector.load %arg5[%c0_13, %c0_14] : memref<128x128xbf16, #tpu.memory_space<vmem>>, vector<128x128xbf16>
    %cst_15 = arith.constant dense<0.000000e+00> : vector<16x128xf32>
    %30 = tpu.matmul %28, %29, %cst_15 {dimension_numbers = #tpu.dot_dimension_numbers<[1], [0], [0], [1], [0, 0, 1, 1], [], []>} : vector<16x128xbf16>, vector<128x128xbf16>, vector<16x128xf32> -> vector<16x128xf32>
    %c0_16 = arith.constant 0 : index
    %c0_17 = arith.constant 0 : index
    %31 = vector.load %arg6[%c0_16, %c0_17] : memref<2x128xf32, #tpu.memory_space<vmem>>, vector<1x128xf32>
    %32 = vector.broadcast %27 : vector<16x1xf32> to vector<16x128xf32>
    %33 = vector.broadcast %31 : vector<1x128xf32> to vector<16x128xf32>
    %34 = arith.mulf %32, %33 : vector<16x128xf32>
    %35 = arith.addf %30, %34 : vector<16x128xf32>
    %c1 = arith.constant 1 : index
    %c0_18 = arith.constant 0 : index
    %36 = vector.load %arg6[%c1, %c0_18] : memref<2x128xf32, #tpu.memory_space<vmem>>, vector<1x128xf32>
    %37 = vector.broadcast %36 : vector<1x128xf32> to vector<16x128xf32>
    %38 = arith.addf %35, %37 : vector<16x128xf32>
    %cst_19 = arith.constant 0.000000e+00 : f32
    %39 = vector.broadcast %cst_19 : f32 to vector<16x128xf32>
    %40 = arith.maximumf %38, %39 : vector<16x128xf32>
    %c0_20 = arith.constant 0 : index
    %c0_21 = arith.constant 0 : index
    %41 = vector.load %arg7[%c0_20, %c0_21] : memref<16x128xf32, #tpu.memory_space<vmem>>, vector<16x128xf32>
    tpu.vector_store %arg7[%c0_20, %c0_21], %40 {strides = array<i32>} : memref<16x128xf32, #tpu.memory_space<vmem>>, vector<16x128xf32>,
    return
  }
  func.func @transform_0(%arg0: i32) -> (i32, i32) {
    %c0_i32 = arith.constant 0 : i32
    %c0_i32_0 = arith.constant 0 : i32
    return %arg0, %c0_i32 : i32, i32
  }
  func.func @transform_1(%arg0: i32) -> (i32, i32) {
    %c0_i32 = arith.constant 0 : i32
    %c0_i32_0 = arith.constant 0 : i32
    return %arg0, %c0_i32 : i32, i32
  }
  func.func @transform_2(%arg0: i32) -> (i32, i32) {
    %c0_i32 = arith.constant 0 : i32
    %c0_i32_0 = arith.constant 0 : i32
    %c0_i32_1 = arith.constant 0 : i32
    return %c0_i32, %c0_i32_0 : i32, i32
  }
  func.func @transform_3(%arg0: i32) -> (i32, i32) {
    %c0_i32 = arith.constant 0 : i32
    %c0_i32_0 = arith.constant 0 : i32
    %c0_i32_1 = arith.constant 0 : i32
    return %c0_i32, %c0_i32_0 : i32, i32
  }
  func.func @transform_4(%arg0: i32) -> (i32, i32) {
    %c0_i32 = arith.constant 0 : i32
    %c0_i32_0 = arith.constant 0 : i32
    %c0_i32_1 = arith.constant 0 : i32
    return %c0_i32, %c0_i32_0 : i32, i32
  }
  func.func @transform_5(%arg0: i32) -> (i32, i32) {
    %c0_i32 = arith.constant 0 : i32
    %c0_i32_0 = arith.constant 0 : i32
    %c0_i32_1 = arith.constant 0 : i32
    return %c0_i32, %c0_i32_0 : i32, i32
  }
  func.func @transform_6(%arg0: i32) -> (i32, i32) {
    %c0_i32 = arith.constant 0 : i32
    %c0_i32_0 = arith.constant 0 : i32
    return %arg0, %c0_i32 : i32, i32
  }
}

</mosaic_0001>

<bundles_post_ra>
// kernel: tpu_custom_call.1
= control target key start
LH: loop header
LB: loop body
LE: loop exit
PB: predicated region body
PF: predicated region fallthrough
CT: control target
= control target key end

     0   :  { %11 = vsyncpa [#allocation3], 0  ;;  %s856_s0 = inlined_call_operand.vmem [shape: bf16[16,128], index: 0, kind: input, shape index: {}]   ;;  %s857_s1 = inlined_call_operand.vmem [shape: f32[16,1], index: 1, kind: input, shape index: {}]   ;;  %s858_s2 = inlined_call_operand.hbm [shape: bf16[128,384], index: 2, kind: input, shape index: {}]   ;;  %s859_s3 = inlined_call_operand.vmem [shape: f32[1,384], index: 3, kind: input, shape index: {}]   ;;  %s860_s4 = inlined_call_operand.hbm [shape: bf16[128,128], index: 4, kind: input, shape index: {}]   ;;  %s861_s5 = inlined_call_operand.vmem [shape: f32[2,128], index: 5, kind: input, shape index: {}]   ;;  %s862_s6 = inlined_call_operand.hbm [shape: f32[16,128], index: 6, kind: output, shape index: {}]  }
   0x1   :  { %12 = vsyncpa [#allocation6], 0 }
   0x2   :  { %13 = vsyncpa [#allocation4], 0  ;;  %s735_s21 = smov [#allocation2]   ;;  %s663_s25 = scalar_lea.hbm %s858_s2, 3072 }
   0x3   :  { %s23_s22 = sshll.u32 %s735_s21, 4  ;;  %p664_p0 = scmp.ne.s32.totalorder %s858_s2, %s663_s25  ;;  %s24_s22 = int_to_ptr.vmem [resolvable:$true] %s23_s22 }
   0x4   :  { %p667_p1 = scmp.lt.u32.totalorder %s663_s25, %s858_s2 }
   0x6   :  { %p669_p2 = pnand %p667_p1, %p664_p0 }
   0x8   :  { %672 = shalt.err (!%p669_p2)
}
   0x9   :  { %s673_s30 = scalar_lea.vmem %s24_s22, 3072  ;;  %p678_p4 = scmp.lt.s32.totalorder %s24_s22, %s24_s22 }
   0xa   :  { %p674_p3 = scmp.ne.s32.totalorder %s24_s22, %s673_s30  ;;  %p679_p5 = scmp.lt.s32.totalorder %s673_s30, %s673_s30 }
   0xc   :  { %p680_p6 = por %p679_p5, %p678_p4 }
   0xe   :  { %p681_p7 = pnand %p680_p6, %p674_p3 }
  0x10   :  { %684 = shalt.err (!%p681_p7)
}
  0x11   :  { %s736_s7 = smov 192   ;;  %s737_s8 = smov 12  }
  0x12   :  { %29 = dma.hbm_to_vmem [thread:$0]  %s858_s2, 3072, %s24_s22, [#allocation3], %s736_s7, %s736_s7, %s737_s8  }
  0x13   :  { %s738_s11 = smov [#allocation5]   ;;  %s685_s15 = scalar_lea.hbm %s860_s4, 1024 }
  0x14   :  { %s37_s12 = sshll.u32 %s738_s11, 4  ;;  %p686_p8 = scmp.ne.s32.totalorder %s860_s4, %s685_s15  ;;  %s38_s12 = int_to_ptr.vmem [resolvable:$true] %s37_s12 }
  0x15   :  { %p689_p9 = scmp.lt.u32.totalorder %s685_s15, %s860_s4 }
  0x17   :  { %p691_p10 = pnand %p689_p9, %p686_p8 }
  0x19   :  { %694 = shalt.err (!%p691_p10)
}
  0x1a   :  { %s695_s20 = scalar_lea.vmem %s38_s12, 1024  ;;  %p700_p12 = scmp.lt.s32.totalorder %s38_s12, %s38_s12 }
  0x1b   :  { %p696_p11 = scmp.ne.s32.totalorder %s38_s12, %s695_s20  ;;  %p701_p13 = scmp.lt.s32.totalorder %s695_s20, %s695_s20 }
  0x1d   :  { %p702_p0 = por %p701_p13, %p700_p12 }
  0x1f   :  { %p703_p1 = pnand %p702_p0, %p696_p11 }
  0x21   :  { %706 = shalt.err (!%p703_p1)
}
  0x22   :  { %s739_s2 = smov 64   ;;  %s740_s21 = smov 4  }
  0x23   :  { %43 = dma.hbm_to_vmem [thread:$0]  %s860_s4, 1024, %s38_s12, [#allocation6], %s739_s2, %s739_s2, %s740_s21  }
  0x24   :  { %729 = dma.done.wait [#allocation3], 3072  }
  0x25   :  { %730 = vsyncadd [#allocation3], 4294964224 }
  0x26   :  { %731 = dma.done.wait [#allocation6], 1024  }
  0x27   :  { %732 = vsyncadd [#allocation6], 4294966272  ;;  %v741_v0 = vmov 0.0   ;;  %v742_v1 = vmov 0   ;;  %vm743_vm0 = vmmov 0   ;;  %v636_v25 = vld [vmem:[%s856_s0] sm:$0xff]   ;;  %v89_v37 = vlaneseq }
  0x28   :  { %553 = vmatprep.subr.bf16.mxu1 %v741_v0  ;;  %270 = vmatprep.mubr.bf16.mxu0 %v742_v1  ;;  %v606_v2 = vld [vmem:[#allocation2 + $0x4] ss:$12 sps:$4 sm:$0xff]   ;;  %v608_v3 = vld [vmem:[#allocation2] ss:$12 sps:$4 sm:$0xff]   ;;  %v609_v4 = vld [vmem:[#allocation2 + $0x1c] ss:$12 sps:$4 sm:$0xff]  }
  0x29   :  { %569 = vmatprep.mubr.msk.bf16.mxu1 %vm743_vm0, %v741_v0  ;;  %605 = vset.pattern.permute.xlu0 %v742_v1  ;;  %v611_v5 = vld [vmem:[#allocation2 + $0x18] ss:$12 sps:$4 sm:$0xff]   ;;  %v612_v6 = vld [vmem:[#allocation2 + $0x34] ss:$12 sps:$4 sm:$0xff]   ;;  %v614_v8 = vld [vmem:[#allocation2 + $0x30] ss:$12 sps:$4 sm:$0xff]  }
  0x2a   :  { %238 = vmatprep.subr.bf16.mxu0 %v606_v2  ;;  %v615_v7 = vld [vmem:[#allocation2 + $0x8] ss:$12 sps:$4 sm:$0xff]   ;;  %v619_v9 = vld [vmem:[#allocation2 + $0x20] ss:$12 sps:$4 sm:$0xff]   ;;  %v623_v11 = vld [vmem:[#allocation2 + $0x38] ss:$12 sps:$4 sm:$0xff]  }
  0x2b   :  { %239 = vmatpush1.bf16.msra.mxu0 %v608_v3  ;;  %554 = vmatpush3.bf16.msra.mxu1 %v615_v7  ;;  %v616_v10 = vld [vmem:[#allocation2 + $0x4c] ss:$12 sps:$4 sm:$0xff]   ;;  %v618_v12 = vld [vmem:[#allocation2 + $0x48] ss:$12 sps:$4 sm:$0xff]   ;;  %v620_v13 = vld [vmem:[#allocation2 + $0x64] ss:$12 sps:$4 sm:$0xff]  }
  0x2c   :  { %240 = vmatprep.subr.bf16.mxu0 %v609_v4  ;;  %555 = vmatprep.subr.bf16.mxu1 %v741_v0  ;;  %v627_v14 = vld [vmem:[#allocation2 + $0x50] ss:$12 sps:$4 sm:$0xff]   ;;  %v622_v15 = vld [vmem:[#allocation2 + $0x60] ss:$12 sps:$4 sm:$0xff]   ;;  %v631_v17 = vld [vmem:[#allocation2 + $0x68] ss:$12 sps:$4 sm:$0xff]  }
  0x2d   :  { %v624_v16 = vld [vmem:[#allocation2 + $0x7c] ss:$12 sps:$4 sm:$0xff]   ;;  %v626_v18 = vld [vmem:[#allocation2 + $0x78] ss:$12 sps:$4 sm:$0xff]   ;;  %v628_v19 = vld [vmem:[#allocation2 + $0x94] ss:$12 sps:$4 sm:$0xff]  }
  0x2e   :  { %v635_v20 = vld [vmem:[#allocation2 + $0x80] ss:$12 sps:$4 sm:$0xff]   ;;  %v630_v21 = vld [vmem:[#allocation2 + $0x90] ss:$12 sps:$4 sm:$0xff]   ;;  %v637_v23 = vld [vmem:[#allocation2 + $0x98] ss:$12 sps:$4 sm:$0xff]  }
  0x2f   :  { %241 = vmatpush1.bf16.msra.mxu0 %v611_v5  ;;  %556 = vmatpush3.bf16.msra.mxu1 %v619_v9  ;;  %v632_v22 = vld [vmem:[#allocation2 + $0xac] ss:$12 sps:$4 sm:$0xff]   ;;  %v634_v24 = vld [vmem:[#allocation2 + $0xa8] ss:$12 sps:$4 sm:$0xff]   ;;  %v638_v26 = vld [vmem:[#allocation2 + $0xb0] ss:$12 sps:$4 sm:$0xff]  }
  0x30   :  { %242 = vmatprep.subr.bf16.mxu0 %v612_v6  ;;  %557 = vmatprep.subr.bf16.mxu1 %v741_v0  ;;  %v639_v27 = vld [vmem:[#allocation5] sm:$0xff]   ;;  %v640_v28 = vld [vmem:[#allocation5 + $0x8] sm:$0xff]   ;;  %v641_v29 = vld [vmem:[#allocation5 + $0x10] sm:$0xff]   ;;  %v90_v38 = vshrl.u32 %v89_v37, 7  ;;  %s744_s8 = smov [#allocation7]  }
  0x31   :  { %v642_v30 = vld [vmem:[#allocation5 + $0x18] sm:$0xff]   ;;  %v643_v31 = vld [vmem:[#allocation5 + $0x20] sm:$0xff]   ;;  %v644_v32 = vld [vmem:[#allocation5 + $0x28] sm:$0xff]   ;;  %s487_s9 = sshll.u32 %s744_s8, 4  ;;  %s488_s9 = int_to_ptr.vmem [resolvable:$true] %s487_s9 }
  0x32   :  { %v645_v33 = vld [vmem:[#allocation5 + $0x30] sm:$0xff]   ;;  %v646_v34 = vld [vmem:[#allocation5 + $0x38] sm:$0xff]   ;;  %v346_v35 = vld [vmem:[%s857_s1] sm:$0xff]  ;;  %v91_v39 = vsub.s32 0, %v90_v38  ;;  %v99_v41 = vsub.s32 2, %v90_v38  ;;  %v95_v43 = vsub.s32 1, %v90_v38  ;;  %p712_p3 = scmp.lt.s32.totalorder %s488_s9, %s488_s9 }
  0x33   :  { %243 = vmatpush1.bf16.msra.mxu0 %v614_v8  ;;  %558 = vmatpush3.bf16.msra.mxu1 %v623_v11  ;;  %v347_v36 = vld [vmem:[%s857_s1 + $0x8] sm:$0xff]  ;;  %v87_v40 = vld [vmem:[%s859_s3] sm:$0x7]  ;;  %s707_s10 = scalar_lea.vmem %s488_s9, 256 }
  0x34   :  { %244 = vmatprep.subr.bf16.mxu0 %v616_v10  ;;  %559 = vmatprep.subr.bf16.mxu1 %v741_v0  ;;  %v92_v42 = vrot.slane %v87_v40, %v91_v39  ;;  %v100_v45 = vrot.slane %v87_v40, %v99_v41  ;;  %v96_v47 = vrot.slane %v87_v40, %v95_v43  ;;  %p708_p2 = scmp.ne.s32.totalorder %s488_s9, %s707_s10  ;;  %p713_p4 = scmp.lt.s32.totalorder %s707_s10, %s707_s10 }
  0x35   :  { %368 = vperm.xlu0 %605, %v346_v35  }
  0x36   :  { %p714_p5 = por %p713_p4, %p712_p3 }
  0x37   :  { %245 = vmatpush1.bf16.msra.mxu0 %v618_v12  ;;  %560 = vmatpush3.bf16.msra.mxu1 %v627_v14 }
  0x38   :  { %246 = vmatprep.subr.bf16.mxu0 %v620_v13  ;;  %561 = vmatprep.subr.bf16.mxu1 %v741_v0  ;;  %p715_p6 = pnand %p714_p5, %p708_p2 }
  0x39   :  { %373 = vperm.xlu0 %605, %v347_v36  }
  0x3b   :  { %247 = vmatpush1.bf16.msra.mxu0 %v622_v15  ;;  %562 = vmatpush3.bf16.msra.mxu1 %v631_v17 }
  0x3c   :  { %248 = vmatprep.subr.bf16.mxu0 %v624_v16  ;;  %563 = vmatprep.subr.bf16.mxu1 %v741_v0 }
  0x3f   :  { %249 = vmatpush1.bf16.msra.mxu0 %v626_v18  ;;  %564 = vmatpush3.bf16.msra.mxu1 %v635_v20 }
  0x40   :  { %250 = vmatprep.subr.bf16.mxu0 %v628_v19  ;;  %565 = vmatprep.subr.bf16.mxu1 %v741_v0 }
  0x43   :  { %251 = vmatpush1.bf16.msra.mxu0 %v630_v21  ;;  %566 = vmatpush3.bf16.msra.mxu1 %v637_v23 }
  0x44   :  { %252 = vmatprep.subr.bf16.mxu0 %v632_v22  ;;  %567 = vmatprep.subr.bf16.mxu1 %v741_v0  ;;  %v525_v22 = vld [vmem:[%s861_s5] ss:$0 sm:$0xff] }
  0x47   :  { %253 = vmatpush1.bf16.msra.mxu0 %v634_v24  ;;  %568 = vmatpush3.bf16.msra.mxu1 %v638_v26  ;;  %v534_v26 = vld [vmem:[%s861_s5 + $0x1] ss:$0 sm:$0xff] }
  0x48   :  { %573 = vmatprep.subr.bf16.mxu0 %v741_v0 }
  0x4a   :  { %271 = vmatmul.mubr.bf16.vlgmr.msra.gmra.mrb[0].mxu0 %v636_v25  ;;  %570 = vmatmul.mubr.bf16.vlgmr.msra.gmra.mrb[0].mxu1 %v636_v25 }
  0x4b   :  { %589 = vmatprep.mubr.msk.bf16.mxu0 %vm743_vm0, %v741_v0  ;;  %574 = vmatpush3.bf16.msra.mxu0 %v639_v27 }
  0x4c   :  { %575 = vmatprep.subr.bf16.mxu0 %v741_v0 }
  0x4f   :  { %576 = vmatpush3.bf16.msra.mxu0 %v640_v28 }
  0x50   :  { %577 = vmatprep.subr.bf16.mxu0 %v741_v0 }
  0x53   :  { %578 = vmatpush3.bf16.msra.mxu0 %v641_v29 }
  0x54   :  { %579 = vmatprep.subr.bf16.mxu0 %v741_v0 }
  0x57   :  { %580 = vmatpush3.bf16.msra.mxu0 %v642_v30 }
  0x58   :  { %581 = vmatprep.subr.bf16.mxu0 %v741_v0 }
  0x5b   :  { %582 = vmatpush3.bf16.msra.mxu0 %v643_v31 }
  0x5c   :  { %583 = vmatprep.subr.bf16.mxu0 %v741_v0 }
  0x5f   :  { %584 = vmatpush3.bf16.msra.mxu0 %v644_v32 }
  0x60   :  { %585 = vmatprep.subr.bf16.mxu0 %v741_v0 }
  0x63   :  { %586 = vmatpush3.bf16.msra.mxu0 %v645_v33 }
  0x64   :  { %587 = vmatprep.subr.bf16.mxu0 %v741_v0 }
  0x67   :  { %588 = vmatpush3.bf16.msra.mxu0 %v646_v34 }
  0xb4   :  { %v369_v21 = vpop.permute.xlu0 %368 }
  0xb5   :  { %v380_v24 = vmul.f32 %v525_v22, %v369_v21 }
  0xb8   :  { %v374_v23 = vpop.permute.xlu0 %373 }
  0xb9   :  { %v381_v27 = vmul.f32 %v525_v22, %v374_v23 }
 0x11d   :  { %v272_v44 = vpop.f32.mrb[0].mxu0  ;;  %v315_v53 = vpop.f32.mrb[0].mxu1 }
 0x11e   :  { %v273_v46 = vadd.f32 %v272_v44, %v92_v42  ;;  %v274_v48 = vpop.f32.mrb[1].mxu0  ;;  %v316_v54 = vadd.f32 %v315_v53, %v100_v45  ;;  %v571_v55 = vpop.f32.mrb[1].mxu1 }
 0x11f   :  { %v276_v49 = vpop.f32.mrb[2].mxu0  ;;  %v275_v56 = vadd.f32 %v274_v48, %v96_v47  ;;  %v318_v58 = vpop.f32.mrb[2].mxu1 }
 0x120   :  { %v322_v50 = vmul.f32 0.5, %v273_v46  ;;  %v277_v51 = vadd.f32 %v276_v49, %v92_v42  ;;  %v278_v52 = vpop.f32.mrb[3].mxu0  ;;  %v572_v59 = vpop.f32.mrb[3].mxu1  ;;  %v332_v61 = vmul.f32 0.5, %v316_v54  ;;  %v319_v62 = vadd.f32 %v318_v58, %v100_v45 }
 0x121   :  { %v279_v60 = vadd.f32 %v278_v52, %v96_v47 }
 0x122   :  { %647 = vtanh.f32 %v322_v50  ;;  %v323_v57 = vmul.f32 0.5, %v277_v51  ;;  %v333_v63 = vmul.f32 0.5, %v319_v62 }
 0x124   :  { %649 = vtanh.f32 %v323_v57 }
 0x125   :  { %651 = vtanh.f32 %v275_v56 }
 0x126   :  { %653 = vtanh.f32 %v279_v60 }
 0x127   :  { %655 = vtanh.f32 %v332_v61 }
 0x128   :  { %657 = vtanh.f32 %v333_v63 }
 0x12c   :  { %v648_v0 = vpop.eup %647 }
 0x12d   :  { %v326_v1 = vmul.f32 0.5, %v648_v0 }
 0x12e   :  { %v650_v2 = vpop.eup %649 }
 0x12f   :  { %v328_v3 = vadd.f32 0.5, %v326_v1  ;;  %v327_v4 = vmul.f32 0.5, %v650_v2  ;;  %v652_v5 = vpop.eup %651 }
 0x130   :  { %v654_v8 = vpop.eup %653 }
 0x131   :  { %v340_v6 = vmul.f32 %v652_v5, %v328_v3  ;;  %v329_v7 = vadd.f32 0.5, %v327_v4  ;;  %v656_v9 = vpop.eup %655 }
 0x132   :  { %v336_v11 = vmul.f32 0.5, %v656_v9  ;;  %v658_v12 = vpop.eup %657 }
 0x133   :  { %659 = vtanh.f32 %v340_v6  ;;  %v341_v10 = vmul.f32 %v654_v8, %v329_v7  ;;  %v337_v14 = vmul.f32 0.5, %v658_v12 }
 0x134   :  { %v338_v13 = vadd.f32 0.5, %v336_v11 }
 0x135   :  { %661 = vtanh.f32 %v341_v10  ;;  %v339_v17 = vadd.f32 0.5, %v337_v14 }
 0x13d   :  { %v660_v15 = vpop.eup %659 }
 0x13e   :  { %v344_v16 = vmul.f32 %v660_v15, %v338_v13 }
 0x13f   :  { %v662_v18 = vpop.eup %661 }
 0x140   :  { %v345_v19 = vmul.f32 %v662_v18, %v339_v17 }
 0x142   :  { %v348_v20 = vpack.c.bf16 %v345_v19, %v344_v16 }
 0x144   :  { %590 = vmatmul.mubr.bf16.vlgmr.msra.gmra.mrb[4].mxu0 %v348_v20 }
 0x217   :  { %v464_v25 = vpop.f32.mrb[4].mxu0 }
 0x218   :  { %v465_v28 = vadd.f32 %v464_v25, %v380_v24  ;;  %v591_v29 = vpop.f32.mrb[5].mxu0 }
 0x219   :  { %v467_v30 = vpop.f32.mrb[6].mxu0 }
 0x21a   :  { %v476_v31 = vadd.f32 %v534_v26, %v465_v28  ;;  %v468_v32 = vadd.f32 %v467_v30, %v381_v27  ;;  %v592_v33 = vpop.f32.mrb[7].mxu0 }
 0x21c   :  { %v478_v34 = vmax.f32 %v476_v31, 0.0  ;;  %v477_v35 = vadd.f32 %v534_v26, %v468_v32 }
 0x21e   :  { %480 = vst [vmem:[#allocation7] sm:$0xff] %v478_v34  ;;  %v479_v36 = vmax.f32 %v477_v35, 0.0 }
 0x220   :  { %481 = vst [vmem:[#allocation7 + $0x8] sm:$0xff] %v479_v36 }
 0x221   :  { %718 = shalt.err (!%p715_p6)
}
 0x222   :  { %s719_s12 = scalar_lea.hbm %s862_s6, 256 }
 0x223   :  { %p720_p7 = scmp.ne.s32.totalorder %s862_s6, %s719_s12  ;;  %p723_p8 = scmp.lt.u32.totalorder %s719_s12, %s862_s6 }
 0x225   :  { %p725_p9 = pnand %p723_p8, %p720_p7 }
 0x227   :  { %728 = shalt.err (!%p725_p9)
}
 0x228   :  { %s745_s17 = smov 128   ;;  %s746_s18 = smov 8  }
 0x229   :  { %493 = dma.vmem_to_hbm [thread:$0]  %s488_s9, 256, %s862_s6, [#allocation4], %s745_s17, %s745_s17, %s746_s18  }
 0x22a   :  { %733 = dma.done.wait [#allocation4], 256  }
 0x22b   :  { %734 = vsyncadd [#allocation4], 4294967040 }
 0x22c   :  { %497 = vsyncpa [#allocation3], 1 }
 0x22d   :  { %498 = vsyncpa [#allocation6], 1 }
 0x22e   :  { %499 = vsyncpa [#allocation4], 1 }

</bundles_post_ra>
